<compile_context>
chip_gen: v5e
topology: v5e:2x2
jax: 0.10.0
libtpu: 0.0.40
codegen_flags: <defaults>
</compile_context>

<pallas_src>
import functools

import jax
import jax.numpy as jnp
import numpy as np
from jax.experimental import pallas as pl
from jax.experimental.pallas import tpu as pltpu

# Block-sized f32 slabs resident in VMEM at peak:
#   stacked input (2 planes) x 2 pipeline buffers = 4
#   w output x 2 pipeline buffers                 = 2
#   in-kernel temporaries (logits, products)      ~ 2
_RESIDENT_SLABS = 8


def _round_up(x, m):
    return ((x + m - 1) // m) * m


def mlp3_kernel(x_ref, p_ref, o_ref, w_ref, *, seq_axis):
    """One batch block of the MLP3 forward.

    x_ref : (2, R, C) f32 VMEM; plane 0 = x[:, :, 1], plane 1 = x[:, :, 2].
            (R, C) = (TB, L) when seq_axis == 1, (L, TB) when seq_axis == 0.
    p_ref : (3,) f32 SMEM -> [linear_weight, linear_bias, gain / L]
    o_ref : (TB, 1) or (1, TB) f32 VMEM
    w_ref : (TB, L) or (L, TB) f32 VMEM (lane-dense softmax weights)
    """
    W = p_ref[0]
    b = p_ref[1]
    g_over_L = p_ref[2]

    x1 = x_ref[0]                               # feature 1 (returned mean column)
    logits = x_ref[1] * W + b                   # Linear(1,1) applied to feature 2

    # Numerically-stable softmax over the sequence axis. exp() goes straight
    # into the w output tile and is normalized in place (exact divide).
    m = jnp.max(logits, axis=seq_axis, keepdims=True)
    w_ref[...] = jnp.exp(logits - m)
    denom = jnp.sum(w_ref[...], axis=seq_axis, keepdims=True)
    w = w_ref[...] / denom
    w_ref[...] = w

    # mean over L and * gain are folded into one precomputed scalar.
    o_ref[...] = jnp.sum(x1 * w, axis=seq_axis, keepdims=True) * g_over_L


def _vmem_plan():
    """(vmem_limit_bytes, resident-working-set budget) for this chip."""
    try:
        phys = int(pltpu.get_tpu_info().vmem_capacity_bytes)
    except Exception:
        phys = 64 * 1024 * 1024          # conservative: v7x has 64 MiB per core
    vmem_limit = min(phys * 3 // 4, 100 * 1024 * 1024)   # 48 MiB v7x, 96 MiB v5e/v6e
    budget = vmem_limit * 3 // 4                         # leave pipelining headroom
    return vmem_limit, budget


def _pick_tile_seq_lanes(B, L, budget_bytes):
    """Batch tile for the (TB, L) layout (L on lanes). TB multiple of 8 or == B."""
    row_bytes = _round_up(L, 128) * 4                    # padded bytes per batch row
    tb = budget_bytes // (_RESIDENT_SLABS * row_bytes)
    tb = max(8, (tb // 8) * 8)
    if B > 8:
        # Keep >= 2 grid steps so both v7x TensorCores get work.
        tb = min(tb, _round_up(pl.cdiv(B, 2), 8))
    if tb >= B:
        return B
    return tb


def _pick_tile_batch_lanes(B, L, budget_bytes):
    """Batch tile for the (L, TB) layout (batch on lanes). TB multiple of 128 or == B.

    Returns None when no legal tile fits the budget (caller falls back).
    """
    col_bytes = _round_up(L, 8) * 4                      # padded bytes per batch column
    tb_max = budget_bytes // (_RESIDENT_SLABS * col_bytes)
    if B <= 128:
        return B if B <= tb_max else None
    tb = min((tb_max // 128) * 128, _round_up(pl.cdiv(B, 2), 128))
    if tb < 128:
        return None
    return tb


def _jnp_forward(x, linear_w, linear_b, gain):
    """Pure-JAX path: module reference and small-problem fallback."""
    logits = x[:, :, 2:3] * linear_w + linear_b          # Linear(1,1) on feature 2
    w = jax.nn.softmax(logits, axis=1)                   # softmax over L
    o = (x[:, :, :2] * w).mean(axis=1) * gain            # (B, 2)
    return o[:, 1:2], w


def mlp3_forward(x, linear_w, linear_b, gain, *, force_pallas=False):
    """x: (B, L, D) float32, D >= 3. Returns (o[:, 1, None] (B,1), w (B,L,1))."""
    B, L, D = x.shape
    assert D >= 3
    x = x.astype(jnp.float32)

    # Tiny problems: custom-call + ~0.35 us/grid-step overhead dominates; let
    # XLA fuse it instead.
    if not force_pallas and (B * L * 4) < (1 << 20):
        return _jnp_forward(x, linear_w, linear_b, gain)

    vmem_limit, budget = _vmem_plan()

    # Put whichever of {L, batch} fills 128-wide lanes better on the lane axis.
    util_seq = L / _round_up(L, 128)
    util_batch = min(B, 128) / 128.0
    plan = None
    if util_batch > util_seq:
        tb = _pick_tile_batch_lanes(B, L, budget)
        if tb is not None:
            plan = ("batch_lanes", tb)
    if plan is None:
        plan = ("seq_lanes", _pick_tile_seq_lanes(B, L, budget))
    layout, TB = plan

    # Fold gain / L so the kernel does a sum, not a mean + extra multiply.
    params = jnp.array([linear_w, linear_b, gain / L], dtype=jnp.float32)

    grid = (pl.cdiv(B, TB),)
    compiler_params = pltpu.CompilerParams(
        dimension_semantics=("parallel",),               # megacore sharding on v7x
        vmem_limit_bytes=int(vmem_limit),
    )

    if layout == "seq_lanes":
        # One fused slice+transpose: (2, B, L), feature planes stacked in dim 0.
        xs = jnp.transpose(x[:, :, 1:3], (2, 0, 1))
        o2d, w2d = pl.pallas_call(
            functools.partial(mlp3_kernel, seq_axis=1),
            out_shape=(jax.ShapeDtypeStruct((B, 1), jnp.float32),
                       jax.ShapeDtypeStruct((B, L), jnp.float32)),
            grid=grid,
            in_specs=[
                pl.BlockSpec((2, TB, L), lambda i: (0, i, 0)),
                pl.BlockSpec(memory_space=pltpu.MemorySpace.SMEM),
            ],
            out_specs=(
                pl.BlockSpec((TB, 1), lambda i: (i, 0)),
                pl.BlockSpec((TB, L), lambda i: (i, 0)),
            ),
            compiler_params=compiler_params,
        )(xs, params)
        o = o2d                                          # already (B, 1)
        w = w2d[:, :, None]                              # (B, L, 1), reshape is free
    else:
        # Batch on the lane axis: (2, L, B); softmax reduces over sublanes (L).
        xs = jnp.transpose(x[:, :, 1:3], (2, 1, 0))
        o2d, w2d = pl.pallas_call(
            functools.partial(mlp3_kernel, seq_axis=0),
            out_shape=(jax.ShapeDtypeStruct((1, B), jnp.float32),
                       jax.ShapeDtypeStruct((L, B), jnp.float32)),
            grid=grid,
            in_specs=[
                pl.BlockSpec((2, L, TB), lambda i: (0, 0, i)),
                pl.BlockSpec(memory_space=pltpu.MemorySpace.SMEM),
            ],
            out_specs=(
                pl.BlockSpec((1, TB), lambda i: (0, i)),
                pl.BlockSpec((L, TB), lambda i: (0, i)),
            ),
            compiler_params=compiler_params,
        )(xs, params)
        o = jnp.transpose(o2d)                           # (B, 1)
        w = jnp.transpose(w2d)[:, :, None]               # (B, L, 1)
    return o, w


if __name__ == "__main__":
    key = jax.random.PRNGKey(0)
    kw, kb = jax.random.split(key, 2)

    # Deterministic synthetic parameters (shapes from nn.Linear(1,1) + gain).
    linear_w = float(jax.random.normal(kw, ()))          # pl2weight.weight[0, 0]
    linear_b = float(jax.random.normal(kb, ()))          # pl2weight.bias[0]
    gain = 1.0                                           # nn.Parameter(torch.tensor(1.0))

    # Small configs exercising: tiny single-block, multi-block with L on lanes,
    # and the batch-on-lanes layout with >= 2 grid steps.
    shapes = [(2, 8, 4), (16, 128, 4), (256, 8, 4)]
    for idx, (B, L, D) in enumerate(shapes):
        kx = jax.random.fold_in(key, idx)
        x = jax.random.normal(kx, (B, L, D), dtype=jnp.float32)

        o_out, w_out = mlp3_forward(x, linear_w, linear_b, gain, force_pallas=True)
        jax.block_until_ready((o_out, w_out))

        o_ref, w_ref = _jnp_forward(x, linear_w, linear_b, gain)
        np.testing.assert_allclose(np.asarray(o_out), np.asarray(o_ref),
                                   rtol=1e-5, atol=1e-5)
        np.testing.assert_allclose(np.asarray(w_out), np.asarray(w_ref),
                                   rtol=1e-5, atol=1e-5)

    print("KERNEL_OK")
</pallas_src>

<mosaic_0001>
module attributes {stable_mosaic.version = 11 : i64} {
  func.func @mlp3_kernel(%arg0: i32, %arg1: memref<2x2x8xf32, #tpu.memory_space<vmem>>, %arg2: memref<3xf32, #tpu.memory_space<smem>>, %arg3: memref<2x1xf32, #tpu.memory_space<vmem>>, %arg4: memref<2x8xf32, #tpu.memory_space<vmem>>) attributes {dimension_semantics = [#tpu.dimension_semantics<parallel>], iteration_bounds = array<i64: 1>, scalar_prefetch = 0 : i64, scratch_operands = 0 : i64, tpu.core_type = #tpu.core_type<tc>, window_params = [{transform_indices = @transform_0, window_bounds = array<i64: 2, 2, 8>}, {transform_indices = @transform_1, window_bounds = array<i64: 3>}, {transform_indices = @transform_2, window_bounds = array<i64: 2, 1>}, {transform_indices = @transform_3, window_bounds = array<i64: 2, 8>}]} {
    %c0 = arith.constant 0 : index
    %0 = memref.load %arg2[%c0] : memref<3xf32, #tpu.memory_space<smem>>
    %c1 = arith.constant 1 : index
    %1 = memref.load %arg2[%c1] : memref<3xf32, #tpu.memory_space<smem>>
    %c2 = arith.constant 2 : index
    %2 = memref.load %arg2[%c2] : memref<3xf32, #tpu.memory_space<smem>>
    %c0_0 = arith.constant 0 : index
    %c0_1 = arith.constant 0 : index
    %c0_2 = arith.constant 0 : index
    %3 = vector.load %arg1[%c0_0, %c0_1, %c0_2] : memref<2x2x8xf32, #tpu.memory_space<vmem>>, vector<1x2x8xf32>
    %4 = vector.shape_cast %3 : vector<1x2x8xf32> to vector<2x8xf32>
    %c1_3 = arith.constant 1 : index
    %c0_4 = arith.constant 0 : index
    %c0_5 = arith.constant 0 : index
    %5 = vector.load %arg1[%c1_3, %c0_4, %c0_5] : memref<2x2x8xf32, #tpu.memory_space<vmem>>, vector<1x2x8xf32>
    %6 = vector.shape_cast %5 : vector<1x2x8xf32> to vector<2x8xf32>
    %7 = vector.broadcast %0 : f32 to vector<2x8xf32>
    %8 = arith.mulf %6, %7 : vector<2x8xf32>
    %9 = vector.broadcast %1 : f32 to vector<2x8xf32>
    %10 = arith.addf %8, %9 : vector<2x8xf32>
    %cst = arith.constant dense<0xFF800000> : vector<2xf32>
    %11 = vector.multi_reduction <maximumf>, %10, %cst [1] : vector<2x8xf32> to vector<2xf32>
    %12 = vector.shape_cast %11 : vector<2xf32> to vector<2x1xf32>
    %13 = vector.broadcast %12 : vector<2x1xf32> to vector<2x8xf32>
    %14 = arith.subf %10, %13 : vector<2x8xf32>
    %15 = math.exp %14 : vector<2x8xf32>
    %c0_6 = arith.constant 0 : index
    %c0_7 = arith.constant 0 : index
    %16 = vector.load %arg4[%c0_6, %c0_7] : memref<2x8xf32, #tpu.memory_space<vmem>>, vector<2x8xf32>
    tpu.vector_store %arg4[%c0_6, %c0_7], %15 {strides = array<i32>} : memref<2x8xf32, #tpu.memory_space<vmem>>, vector<2x8xf32>,
    %c0_8 = arith.constant 0 : index
    %c0_9 = arith.constant 0 : index
    %17 = vector.load %arg4[%c0_8, %c0_9] : memref<2x8xf32, #tpu.memory_space<vmem>>, vector<2x8xf32>
    %cst_10 = arith.constant dense<0.000000e+00> : vector<2xf32>
    %18 = vector.multi_reduction <add>, %17, %cst_10 [1] : vector<2x8xf32> to vector<2xf32>
    %19 = vector.shape_cast %18 : vector<2xf32> to vector<2x1xf32>
    %c0_11 = arith.constant 0 : index
    %c0_12 = arith.constant 0 : index
    %20 = vector.load %arg4[%c0_11, %c0_12] : memref<2x8xf32, #tpu.memory_space<vmem>>, vector<2x8xf32>
    %21 = vector.broadcast %19 : vector<2x1xf32> to vector<2x8xf32>
    %22 = arith.divf %20, %21 : vector<2x8xf32>
    %c0_13 = arith.constant 0 : index
    %c0_14 = arith.constant 0 : index
    %23 = vector.load %arg4[%c0_13, %c0_14] : memref<2x8xf32, #tpu.memory_space<vmem>>, vector<2x8xf32>
    tpu.vector_store %arg4[%c0_13, %c0_14], %22 {strides = array<i32>} : memref<2x8xf32, #tpu.memory_space<vmem>>, vector<2x8xf32>,
    %24 = arith.mulf %4, %22 : vector<2x8xf32>
    %cst_15 = arith.constant dense<0.000000e+00> : vector<2xf32>
    %25 = vector.multi_reduction <add>, %24, %cst_15 [1] : vector<2x8xf32> to vector<2xf32>
    %26 = vector.shape_cast %25 : vector<2xf32> to vector<2x1xf32>
    %27 = vector.broadcast %2 : f32 to vector<2x1xf32>
    %28 = arith.mulf %26, %27 : vector<2x1xf32>
    %c0_16 = arith.constant 0 : index
    %c0_17 = arith.constant 0 : index
    %29 = vector.load %arg3[%c0_16, %c0_17] : memref<2x1xf32, #tpu.memory_space<vmem>>, vector<2x1xf32>
    tpu.vector_store %arg3[%c0_16, %c0_17], %28 {strides = array<i32>} : memref<2x1xf32, #tpu.memory_space<vmem>>, vector<2x1xf32>,
    return
  }
  func.func @transform_0(%arg0: i32) -> (i32, i32, i32) {
    %c0_i32 = arith.constant 0 : i32
    %c0_i32_0 = arith.constant 0 : i32
    %c0_i32_1 = arith.constant 0 : i32
    return %c0_i32, %arg0, %c0_i32_0 : i32, i32, i32
  }
  func.func @transform_1(%arg0: i32) -> i32 {
    %c0_i32 = arith.constant 0 : i32
    %c0_i32_0 = arith.constant 0 : i32
    return %c0_i32 : i32
  }
  func.func @transform_2(%arg0: i32) -> (i32, i32) {
    %c0_i32 = arith.constant 0 : i32
    %c0_i32_0 = arith.constant 0 : i32
    return %arg0, %c0_i32 : i32, i32
  }
  func.func @transform_3(%arg0: i32) -> (i32, i32) {
    %c0_i32 = arith.constant 0 : i32
    %c0_i32_0 = arith.constant 0 : i32
    return %arg0, %c0_i32 : i32, i32
  }
}

</mosaic_0001>

<bundles_post_ra>
// kernel: tpu_custom_call.1
= control target key start
LH: loop header
LB: loop body
LE: loop exit
PB: predicated region body
PF: predicated region fallthrough
CT: control target
= control target key end

     0   :  { %9 = vsyncpa [#allocation3], 0  ;;  %s230_s0 = inlined_call_operand.hbm [shape: f32[2,2,8], index: 0, kind: input, shape index: {}]   ;;  %s231_s1 = inlined_call_operand.hbm [shape: f32[3], index: 1, kind: input, shape index: {}]   ;;  %s232_s2 = inlined_call_operand.vmem [shape: f32[2,1], index: 2, kind: output, shape index: {0}]   ;;  %s233_s3 = inlined_call_operand.hbm [shape: f32[2,8], index: 3, kind: output, shape index: {1}]  }
   0x1   :  { %10 = vsyncpa [#allocation5], 0 }
   0x2   :  { %11 = vsyncpa [#allocation4], 0  ;;  %s16_s14 = sshll.u32 %s230_s0, 4  ;;  %s188_s15 = smov [#allocation2]   ;;  %s17_s14 = int_to_ptr.hbm [resolvable:$true] %s16_s14 }
   0x3   :  { %s18_s16 = sshll.u32 %s188_s15, 4  ;;  %s30_s19 = sshll.u32 %s231_s1, 4  ;;  %s19_s16 = int_to_ptr.vmem [resolvable:$true] %s18_s16  ;;  %s31_s19 = int_to_ptr.hbm [resolvable:$true] %s30_s19 }
   0x4   :  { %s189_s20 = smov 32   ;;  %s190_s21 = smov 2  }
   0x5   :  { %24 = dma.hbm_to_vmem [thread:$0]  %s17_s14, 64, %s19_s16, [#allocation3], %s189_s20, %s189_s20, %s190_s21  }
   0x6   :  { %s191_s22 = smov [#allocation6]  }
   0x7   :  { %33 = dma.hbm_to_smem %s31_s19, 16, %s191_s22, [#allocation5]  }
   0x8   :  { %182 = dma.done.wait [#allocation3], 64  }
   0x9   :  { %183 = vsyncadd [#allocation3], 4294967232 }
   0xa   :  { %184 = dma.done.wait [#allocation5], 16  }
   0xb   :  { %185 = vsyncadd [#allocation5], 4294967280 }
   0xc   :  { %42 = sfence }
   0xd   :  { %s43_s0 = sld [smem:[#allocation6]]  ;;  %v48_v0 = vld [vmem:[#allocation2 + $0x2] sm:$0x3]  ;;  %vm53_vm0 = vcmask 58368   ;;  %s192_s1 = smov [#allocation7]   ;;  %vm87_vm5 = vcmask 1024  }
   0xe   :  { %s111_s23 = sld [smem:[#allocation6 + $0x1]]  ;;  %s96_s24 = sshll.u32 %s192_s1, 4  ;;  %v46_v22 = vld [vmem:[#allocation2] sm:$0x3]  ;;  %s97_s24 = int_to_ptr.vmem [resolvable:$true] %s96_s24 }
   0xf   :  { %s98_s27 = sshll.u32 %s233_s3, 4  ;;  %s112_s28 = sld [smem:[#allocation6 + $0x2]]  ;;  %s99_s27 = int_to_ptr.hbm [resolvable:$true] %s98_s27 }
  0x13   :  { %v49_v1 = vstv %s43_s0 }
  0x14   :  { %v50_v2 = vmul.f32 %v49_v1, %v48_v0  ;;  %v51_v3 = vstv %s111_s23 }
  0x15   :  { %v85_v27 = vstv %s112_s28 }
  0x16   :  { %v52_v4 = vadd.f32 %v51_v3, %v50_v2 }
  0x18   :  { %v54_v5 = vsel %vm53_vm0, %v52_v4, -inf }
  0x19   :  { %55 = vmax.xlane.f32.xlu0 %v54_v5 }
  0x8c   :  { %v56_v6 = vpop.xlane.xlu0 %55 }
  0x8d   :  { %v57_v7 = vsub.f32 %v52_v4, %v56_v6 }
  0x8f   :  { %v58_v8 = vmul.f32 1.442695, %v57_v7 }
  0x91   :  { %118 = vpow2.f32 %v58_v8 }
  0x97   :  { %v119_v9 = vpop.eup %118 }
  0x98   :  { %60 = vst.msk [vmem:[#allocation7] sm:$0x3] %vm53_vm0, %v119_v9 }
  0x9f   :  { %v61_v10 = vld [vmem:[#allocation7] sm:$0x3] }
  0xa0   :  { %v62_v11 = vsel %vm53_vm0, %v61_v10, 0.0 }
  0xa1   :  { %63 = vadd.xlane.f32.xlu0 %v62_v11 }
 0x114   :  { %v64_v12 = vpop.xlane.xlu0 %63 }
 0x115   :  { %120 = vrcp.f32 %v64_v12  ;;  %v76_v16 = vand.u32 2147483648, %v64_v12  ;;  %v74_v18 = vand.u32 2147483647, %v64_v12  ;;  %vm70_vm2 = vweird.f32 %v64_v12 }
 0x117   :  { %v77_v20 = vor.u32 1.1754944e-38, %v76_v16  ;;  %vm75_vm4 = vcmp.eq.f32.partialorder %v74_v18, 8.507059e+37 }
 0x11b   :  { %v121_v13 = vpop.eup %120 }
 0x11c   :  { %v66_v14 = vmul.f32 %v121_v13, %v64_v12  ;;  %vm71_vm1 = vweird.f32 %v121_v13 }
 0x11d   :  { %vm72_vm3 = vmor %vm70_vm2, %vm71_vm1 }
 0x11e   :  { %v67_v15 = vsub.f32 1.0, %v66_v14 }
 0x120   :  { %v68_v17 = vmul.f32 %v121_v13, %v67_v15 }
 0x122   :  { %v69_v19 = vadd.f32 %v121_v13, %v68_v17 }
 0x124   :  { %v73_v21 = vsel %vm72_vm3, %v121_v13, %v69_v19 }
 0x125   :  { %v78_v23 = vsel %vm75_vm4, %v77_v20, %v73_v21 }
 0x126   :  { %v79_v24 = vmul.f32 %v78_v23, %v61_v10 }
 0x128   :  { %v81_v25 = vmul.f32 %v79_v24, %v46_v22  ;;  %80 = vst.msk [vmem:[#allocation7] sm:$0x3] %vm53_vm0, %v79_v24 }
 0x129   :  { %101 = dma.vmem_to_hbm [thread:$0]  %s97_s24, 32, %s99_s27, [#allocation4]  }
 0x12a   :  { %v82_v26 = vsel %vm53_vm0, %v81_v25, 0.0 }
 0x12b   :  { %83 = vadd.xlane.f32.xlu1 %v82_v26 }
 0x19e   :  { %v84_v28 = vpop.xlane.xlu1 %83 }
 0x19f   :  { %v86_v29 = vmul.f32 %v85_v27, %v84_v28 }
 0x1a1   :  { %88 = vst.msk [vmem:[%s232_s2] sm:$0x3] %vm87_vm5, %v86_v29 }
 0x1a2   :  { %186 = dma.done.wait [#allocation4], 32  }
 0x1a3   :  { %187 = vsyncadd [#allocation4], 4294967264 }
 0x1a4   :  { %108 = vsyncpa [#allocation3], 1 }
 0x1a5   :  { %109 = vsyncpa [#allocation4], 1 }
 0x1a6   :  { %110 = vsyncpa [#allocation5], 1 }

</bundles_post_ra>
